<compile_context>
chip_gen: v7x
topology: tpu7x:2x2x1
jax: 0.10.0
libtpu: 0.0.40
codegen_flags: <defaults>
</compile_context>

<pallas_src>
import jax
import jax.numpy as jnp
from jax.experimental import pallas as pl
from jax.experimental.pallas import tpu as pltpu

# Original model dims
D_IN, H1, H2, D_OUT = 4, 100, 200, 3
# Padded dims: narrow where the block dim equals the full array dim, lane-aligned else.
D_IN_P = 8              # fc1 contraction dim: 4 -> 8 (sublane-aligned, full-array last dim)
H1_P, H2_P = 128, 256   # hidden dims: lane-aligned
D_OUT_P = 8             # output dim: 3 -> 8 (full-array last dim, 16x less writeback)
B3_SEG = 128            # b3 slot inside the fused bias row (keeps offsets 128-aligned)
BIAS_W = H1_P + H2_P + B3_SEG  # 512


def mlp_kernel(x_ref, w1_ref, w2_ref, w3_ref, b_ref, o_ref):
    # Fused bias row layout: [ b1 (128) | b2 (256) | b3 (8, inside a 128 slot) ].
    b1 = b_ref[:, 0:H1_P]                               # (1, 128)
    b2 = b_ref[:, H1_P:H1_P + H2_P]                     # (1, 256)
    b3 = b_ref[:, H1_P + H2_P:H1_P + H2_P + D_OUT_P]    # (1, 8), 128-aligned offset

    # fc1 + ReLU  (bf16 MXU operands, f32 accumulate; pointwise math in f32)
    h1 = jnp.dot(x_ref[...], w1_ref[...], preferred_element_type=jnp.float32)
    h1 = jnp.maximum(h1 + b1, 0.0)
    # fc2 + ReLU
    h2 = jnp.dot(h1.astype(jnp.bfloat16), w2_ref[...],
                 preferred_element_type=jnp.float32)
    h2 = jnp.maximum(h2 + b2, 0.0)
    # fc3 (no activation) -> narrow (TB, 8) result
    out = jnp.dot(h2.astype(jnp.bfloat16), w3_ref[...],
                  preferred_element_type=jnp.float32)
    o_ref[...] = (out + b3).astype(o_ref.dtype)


def _round_up(n, m):
    return ((n + m - 1) // m) * m


def _pad_to(a, shape):
    return jnp.pad(a, [(0, t - s) for s, t in zip(a.shape, shape)])


def init_params(key):
    # Deterministic init mirroring nn.Linear shapes (stored as (in, out) for x @ W).
    k1, k2, k3, k4, k5, k6 = jax.random.split(key, 6)
    scale = 0.1
    w1 = scale * jax.random.normal(k1, (D_IN, H1), jnp.float32)
    b1 = scale * jax.random.normal(k2, (H1,), jnp.float32)
    w2 = scale * jax.random.normal(k3, (H1, H2), jnp.float32)
    b2 = scale * jax.random.normal(k4, (H2,), jnp.float32)
    w3 = scale * jax.random.normal(k5, (H2, D_OUT), jnp.float32)
    b3 = scale * jax.random.normal(k6, (D_OUT,), jnp.float32)
    return w1, b1, w2, b2, w3, b3


def pack_params(w1, b1, w2, b2, w3, b3):
    # Pad once at pack time (not per call). Padded rows/cols are zero -> math unchanged.
    w1p = _pad_to(w1, (D_IN_P, H1_P)).astype(jnp.bfloat16)     # (8, 128)
    w2p = _pad_to(w2, (H1_P, H2_P)).astype(jnp.bfloat16)       # (128, 256)
    w3p = _pad_to(w3, (H2_P, D_OUT_P)).astype(jnp.bfloat16)    # (256, 8)
    bias = jnp.concatenate([
        _pad_to(b1, (H1_P,)),
        _pad_to(b2, (H2_P,)),
        _pad_to(b3, (B3_SEG,)),
    ]).reshape(1, BIAS_W).astype(jnp.float32)                  # (1, 512)
    return w1p, w2p, w3p, bias


def _tile_for_batch(B):
    # Single grid step for small/medium batches (latency path). For larger batches,
    # use ~B/2 tiles (capped at 2048 rows) so the "parallel" grid has >= 2 steps and
    # v7x's two TensorCores both get work; the working set at TB=2048 is only a few
    # MiB, far below the default scoped-VMEM limit on all generations.
    B8 = _round_up(B, 8)
    if B8 <= 512:
        return B8
    return min(2048, _round_up((B8 + 1) // 2, 8))


@jax.jit
def mlp_forward(x, w1p, w2p, w3p, bias):
    B = x.shape[0]
    TB = _tile_for_batch(B)
    B_pad = _round_up(B, TB)

    # Tiny pad (rows -> B_pad, features 4 -> 8); fused under jit, no inflated pass.
    x_pad = jnp.pad(x.astype(jnp.bfloat16),
                    ((0, B_pad - B), (0, D_IN_P - D_IN)))

    out = pl.pallas_call(
        mlp_kernel,
        out_shape=jax.ShapeDtypeStruct((B_pad, D_OUT_P), jnp.float32),
        grid_spec=pltpu.PrefetchScalarGridSpec(
            num_scalar_prefetch=0,
            grid=(B_pad // TB,),
            in_specs=[
                pl.BlockSpec((TB, D_IN_P), lambda i: (i, 0)),      # x: batch-tiled, 8 lanes
                pl.BlockSpec((D_IN_P, H1_P), lambda i: (0, 0)),    # W1: resident
                pl.BlockSpec((H1_P, H2_P), lambda i: (0, 0)),      # W2: resident
                pl.BlockSpec((H2_P, D_OUT_P), lambda i: (0, 0)),   # W3: resident
                pl.BlockSpec((1, BIAS_W), lambda i: (0, 0)),       # fused biases
            ],
            out_specs=pl.BlockSpec((TB, D_OUT_P), lambda i: (i, 0)),
        ),
        compiler_params=pltpu.CompilerParams(
            dimension_semantics=("parallel",)),
    )(x_pad, w1p, w2p, w3p, bias)
    return out[:B, :D_OUT]


def reference_forward_packed(x, w1p, w2p, w3p, bias):
    # Pure-JAX reference mirroring the kernel's bf16/f32 numerics exactly.
    b1 = bias[:, :H1_P]
    b2 = bias[:, H1_P:H1_P + H2_P]
    b3 = bias[:, H1_P + H2_P:H1_P + H2_P + D_OUT_P]
    xb = jnp.pad(x.astype(jnp.bfloat16), ((0, 0), (0, D_IN_P - D_IN)))
    h1 = jnp.maximum(
        jnp.dot(xb, w1p, preferred_element_type=jnp.float32) + b1, 0.0)
    h2 = jnp.maximum(
        jnp.dot(h1.astype(jnp.bfloat16), w2p,
                preferred_element_type=jnp.float32) + b2, 0.0)
    out = jnp.dot(h2.astype(jnp.bfloat16), w3p,
                  preferred_element_type=jnp.float32) + b3
    return out[:, :D_OUT]


if __name__ == "__main__":
    key = jax.random.PRNGKey(0)
    kx, kp = jax.random.split(key)

    # Iris-like input: batch of 8 samples, 4 features each.
    x = jax.random.normal(kx, (8, D_IN), jnp.float32)
    raw = init_params(kp)
    packed = pack_params(*raw)

    out = jax.block_until_ready(mlp_forward(x, *packed))
    assert out.shape == (8, D_OUT), out.shape

    # Tight check vs. a reference with identical bf16/f32 numerics.
    ref = reference_forward_packed(x, *packed)
    assert jnp.allclose(out, ref, atol=2e-3, rtol=2e-3), "mismatch vs packed reference"

    # Loose sanity check vs. the original full-f32 model semantics.
    w1, b1, w2, b2, w3, b3 = raw
    ref32 = jnp.maximum(x @ w1 + b1, 0.0)
    ref32 = jnp.maximum(ref32 @ w2 + b2, 0.0)
    ref32 = ref32 @ w3 + b3
    assert jnp.allclose(out, ref32, atol=5e-2, rtol=5e-2), "drift vs f32 reference"

    print("KERNEL_OK")
</pallas_src>

<mosaic_0001>
module attributes {stable_mosaic.version = 11 : i64} {
  func.func @mlp_kernel(%arg0: i32, %arg1: memref<8x8xbf16, #tpu.memory_space<vmem>>, %arg2: memref<8x128xbf16, #tpu.memory_space<vmem>>, %arg3: memref<128x256xbf16, #tpu.memory_space<vmem>>, %arg4: memref<256x8xbf16, #tpu.memory_space<vmem>>, %arg5: memref<1x512xf32, #tpu.memory_space<vmem>>, %arg6: memref<8x8xf32, #tpu.memory_space<vmem>>) attributes {dimension_semantics = [#tpu.dimension_semantics<parallel>], iteration_bounds = array<i64: 1>, scalar_prefetch = 0 : i64, scratch_operands = 0 : i64, tpu.core_type = #tpu.core_type<tc>, window_params = [{transform_indices = @transform_0, window_bounds = array<i64: 8, 8>}, {pipeline_mode = #tpu.pipeline_mode<synchronous>, transform_indices = @transform_1, window_bounds = array<i64: 8, 128>}, {pipeline_mode = #tpu.pipeline_mode<synchronous>, transform_indices = @transform_2, window_bounds = array<i64: 128, 256>}, {pipeline_mode = #tpu.pipeline_mode<synchronous>, transform_indices = @transform_3, window_bounds = array<i64: 256, 8>}, {pipeline_mode = #tpu.pipeline_mode<synchronous>, transform_indices = @transform_4, window_bounds = array<i64: 1, 512>}, {transform_indices = @transform_5, window_bounds = array<i64: 8, 8>}]} {
    %c0 = arith.constant 0 : index
    %c0_0 = arith.constant 0 : index
    %0 = vector.load %arg5[%c0, %c0_0] : memref<1x512xf32, #tpu.memory_space<vmem>>, vector<1x128xf32>
    %c0_1 = arith.constant 0 : index
    %c128 = arith.constant 128 : index
    %1 = vector.load %arg5[%c0_1, %c128] : memref<1x512xf32, #tpu.memory_space<vmem>>, vector<1x256xf32>
    %c0_2 = arith.constant 0 : index
    %c384 = arith.constant 384 : index
    %2 = vector.load %arg5[%c0_2, %c384] : memref<1x512xf32, #tpu.memory_space<vmem>>, vector<1x8xf32>
    %c0_3 = arith.constant 0 : index
    %c0_4 = arith.constant 0 : index
    %3 = vector.load %arg1[%c0_3, %c0_4] : memref<8x8xbf16, #tpu.memory_space<vmem>>, vector<8x8xbf16>
    %c0_5 = arith.constant 0 : index
    %c0_6 = arith.constant 0 : index
    %4 = vector.load %arg2[%c0_5, %c0_6] : memref<8x128xbf16, #tpu.memory_space<vmem>>, vector<8x128xbf16>
    %cst = arith.constant dense<0.000000e+00> : vector<8x128xf32>
    %5 = tpu.matmul %3, %4, %cst {dimension_numbers = #tpu.dot_dimension_numbers<[1], [0], [0], [1], [0, 0, 1, 1], [], []>} : vector<8x8xbf16>, vector<8x128xbf16>, vector<8x128xf32> -> vector<8x128xf32>
    %6 = vector.broadcast %0 : vector<1x128xf32> to vector<8x128xf32>
    %7 = arith.addf %5, %6 : vector<8x128xf32>
    %cst_7 = arith.constant 0.000000e+00 : f32
    %8 = vector.broadcast %cst_7 : f32 to vector<8x128xf32>
    %9 = arith.maximumf %7, %8 : vector<8x128xf32>
    %10 = arith.truncf %9 : vector<8x128xf32> to vector<8x128xbf16>
    %c0_8 = arith.constant 0 : index
    %c0_9 = arith.constant 0 : index
    %11 = vector.load %arg3[%c0_8, %c0_9] : memref<128x256xbf16, #tpu.memory_space<vmem>>, vector<128x256xbf16>
    %cst_10 = arith.constant dense<0.000000e+00> : vector<8x256xf32>
    %12 = tpu.matmul %10, %11, %cst_10 {dimension_numbers = #tpu.dot_dimension_numbers<[1], [0], [0], [1], [0, 0, 1, 1], [], []>} : vector<8x128xbf16>, vector<128x256xbf16>, vector<8x256xf32> -> vector<8x256xf32>
    %13 = vector.broadcast %1 : vector<1x256xf32> to vector<8x256xf32>
    %14 = arith.addf %12, %13 : vector<8x256xf32>
    %cst_11 = arith.constant 0.000000e+00 : f32
    %15 = vector.broadcast %cst_11 : f32 to vector<8x256xf32>
    %16 = arith.maximumf %14, %15 : vector<8x256xf32>
    %17 = arith.truncf %16 : vector<8x256xf32> to vector<8x256xbf16>
    %c0_12 = arith.constant 0 : index
    %c0_13 = arith.constant 0 : index
    %18 = vector.load %arg4[%c0_12, %c0_13] : memref<256x8xbf16, #tpu.memory_space<vmem>>, vector<256x8xbf16>
    %cst_14 = arith.constant dense<0.000000e+00> : vector<8x8xf32>
    %19 = tpu.matmul %17, %18, %cst_14 {dimension_numbers = #tpu.dot_dimension_numbers<[1], [0], [0], [1], [0, 0, 1, 1], [], []>} : vector<8x256xbf16>, vector<256x8xbf16>, vector<8x8xf32> -> vector<8x8xf32>
    %20 = vector.broadcast %2 : vector<1x8xf32> to vector<8x8xf32>
    %21 = arith.addf %19, %20 : vector<8x8xf32>
    %c0_15 = arith.constant 0 : index
    %c0_16 = arith.constant 0 : index
    %22 = vector.load %arg6[%c0_15, %c0_16] : memref<8x8xf32, #tpu.memory_space<vmem>>, vector<8x8xf32>
    tpu.vector_store %arg6[%c0_15, %c0_16], %21 {strides = array<i32>} : memref<8x8xf32, #tpu.memory_space<vmem>>, vector<8x8xf32>,
    return
  }
  func.func @transform_0(%arg0: i32) -> (i32, i32) {
    %c0_i32 = arith.constant 0 : i32
    %c0_i32_0 = arith.constant 0 : i32
    return %arg0, %c0_i32 : i32, i32
  }
  func.func @transform_1(%arg0: i32) -> (i32, i32) {
    %c0_i32 = arith.constant 0 : i32
    %c0_i32_0 = arith.constant 0 : i32
    %c0_i32_1 = arith.constant 0 : i32
    return %c0_i32, %c0_i32_0 : i32, i32
  }
  func.func @transform_2(%arg0: i32) -> (i32, i32) {
    %c0_i32 = arith.constant 0 : i32
    %c0_i32_0 = arith.constant 0 : i32
    %c0_i32_1 = arith.constant 0 : i32
    return %c0_i32, %c0_i32_0 : i32, i32
  }
  func.func @transform_3(%arg0: i32) -> (i32, i32) {
    %c0_i32 = arith.constant 0 : i32
    %c0_i32_0 = arith.constant 0 : i32
    %c0_i32_1 = arith.constant 0 : i32
    return %c0_i32, %c0_i32_0 : i32, i32
  }
  func.func @transform_4(%arg0: i32) -> (i32, i32) {
    %c0_i32 = arith.constant 0 : i32
    %c0_i32_0 = arith.constant 0 : i32
    %c0_i32_1 = arith.constant 0 : i32
    return %c0_i32, %c0_i32_0 : i32, i32
  }
  func.func @transform_5(%arg0: i32) -> (i32, i32) {
    %c0_i32 = arith.constant 0 : i32
    %c0_i32_0 = arith.constant 0 : i32
    return %arg0, %c0_i32 : i32, i32
  }
}

</mosaic_0001>

<bundles_post_ra>
// kernel: mlp_forward.1
= control target key start
LH: loop header
LB: loop body
LE: loop exit
PB: predicated region body
PF: predicated region fallthrough
CT: control target
= control target key end

     0   :  { %vm36_vm0 = vcmask 1043456   ;;  %v521_v0 = vmov 0.0   ;;  %vm522_vm1 = vmmov 0   ;;  %vm32_vm2 = vcmask 64512   ;;  %s670_s1 = inlined_call_operand.vmem [shape: bf16[8,128], index: 1, kind: input, shape index: {}]   ;;  %s671_s0 = inlined_call_operand.vmem [shape: bf16[8,8], index: 0, kind: input, shape index: {}]   ;;  %s672_s2 = inlined_call_operand.vmem [shape: bf16[128,256], index: 2, kind: input, shape index: {}]   ;;  %s673_s3 = inlined_call_operand.vmem [shape: bf16[256,8], index: 3, kind: input, shape index: {}]   ;;  %s674_s4 = inlined_call_operand.vmem [shape: f32[1,512], index: 4, kind: input, shape index: {}]   ;;  %s675_s5 = inlined_call_operand.vmem [shape: f32[8,8], index: 5, kind: output, shape index: {}]  }
   0x1   :  { %472 = vmatprep.subr.bf16.mxu0 %v521_v0  ;;  %v25_v1 = vld [vmem:[%s670_s1] sm:$0xf]  ;;  %474 = vmatprep.mubr.msk.bf16.mxu0 %vm522_vm1, %v521_v0  ;;  %v481_v4 = vld [vmem:[%s672_s2 + $0x4] ss:$8 sps:$4 sm:$0xff]   ;;  %v484_v6 = vld [vmem:[%s672_s2 + $0x14] ss:$8 sps:$4 sm:$0xff]   ;;  %v99_v45 = vlaneseq }
   0x2   :  { %v24_v2 = vld [vmem:[%s671_s0] sm:$0xf]  ;;  %v38_v3 = vsel %vm36_vm0, %v25_v1, 0  ;;  %189 = vmatprep.subr.bf16.mxu1 %v481_v4  ;;  %v486_v7 = vld [vmem:[%s672_s2 + $0x10] ss:$8 sps:$4 sm:$0xff]   ;;  %v523_v20 = vmov 0  }
   0x3   :  { %v483_v5 = vld [vmem:[%s672_s2] ss:$8 sps:$4 sm:$0xff]   ;;  %473 = vmatpush3.bf16.msra.mxu0 %v38_v3  ;;  %v487_v8 = vld [vmem:[%s672_s2 + $0x24] ss:$8 sps:$4 sm:$0xff]   ;;  %v490_v10 = vld [vmem:[%s672_s2 + $0x34] ss:$8 sps:$4 sm:$0xff]   ;;  %221 = vmatprep.mubr.bf16.mxu1 %v523_v20 }
   0x4   :  { %190 = vmatpush1.bf16.msra.mxu1 %v483_v5  ;;  %v489_v9 = vld [vmem:[%s672_s2 + $0x20] ss:$8 sps:$4 sm:$0xff]   ;;  %v492_v11 = vld [vmem:[%s672_s2 + $0x30] ss:$8 sps:$4 sm:$0xff]   ;;  %v493_v12 = vld [vmem:[%s672_s2 + $0x44] ss:$8 sps:$4 sm:$0xff]  }
   0x5   :  { %191 = vmatprep.subr.bf16.mxu1 %v484_v6  ;;  %v495_v13 = vld [vmem:[%s672_s2 + $0x40] ss:$8 sps:$4 sm:$0xff]   ;;  %v496_v14 = vld [vmem:[%s672_s2 + $0x54] ss:$8 sps:$4 sm:$0xff]   ;;  %v498_v15 = vld [vmem:[%s672_s2 + $0x50] ss:$8 sps:$4 sm:$0xff]  }
   0x6   :  { %475 = vmatmul.mubr.msk.bf16.vlgmr.msra.gmra.mrb[0].mxu0 %vm32_vm2, %v24_v2  ;;  %v499_v16 = vld [vmem:[%s672_s2 + $0x64] ss:$8 sps:$4 sm:$0xff]   ;;  %v501_v17 = vld [vmem:[%s672_s2 + $0x60] ss:$8 sps:$4 sm:$0xff]   ;;  %v502_v18 = vld [vmem:[%s672_s2 + $0x74] ss:$8 sps:$4 sm:$0xff]  }
   0x7   :  { %v504_v19 = vld [vmem:[%s672_s2 + $0x70] ss:$8 sps:$4 sm:$0xff]   ;;  %v505_v21 = vld [vmem:[%s673_s3 + $0x40] sm:$0xff]   ;;  %v507_v23 = vld [vmem:[%s673_s3 + $0x48] sm:$0xff]   ;;  %v100_v46 = vshrl.u32 %v99_v45, 7 }
   0x8   :  { %192 = vmatpush1.bf16.msra.mxu1 %v486_v7  ;;  %v506_v22 = vld [vmem:[%s673_s3] sm:$0xff]   ;;  %450 = vmatprep.subr.bf16.mxu0 %v505_v21  ;;  %v508_v24 = vld [vmem:[%s673_s3 + $0x8] sm:$0xff]   ;;  %v509_v25 = vld [vmem:[%s673_s3 + $0x50] sm:$0xff]  }
   0x9   :  { %193 = vmatprep.subr.bf16.mxu1 %v487_v8  ;;  %451 = vmatpush3.bf16.msra.mxu0 %v506_v22  ;;  %v510_v26 = vld [vmem:[%s673_s3 + $0x10] sm:$0xff]   ;;  %v511_v27 = vld [vmem:[%s673_s3 + $0x58] sm:$0xff]   ;;  %v513_v29 = vld [vmem:[%s673_s3 + $0x60] sm:$0xff]   ;;  %v101_v47 = vsub.s32 0, %v100_v46  ;;  %v105_v49 = vsub.s32 1, %v100_v46 }
   0xa   :  { %452 = vmatprep.subr.bf16.mxu0 %v507_v23  ;;  %v512_v28 = vld [vmem:[%s673_s3 + $0x18] sm:$0xff]   ;;  %v514_v30 = vld [vmem:[%s673_s3 + $0x20] sm:$0xff]   ;;  %v515_v31 = vld [vmem:[%s673_s3 + $0x68] sm:$0xff]  }
   0xb   :  { %v516_v32 = vld [vmem:[%s673_s3 + $0x28] sm:$0xff]   ;;  %v413_v33 = vld [vmem:[%s674_s4] ss:$0 sm:$0xff]  ;;  %v517_v41 = vld [vmem:[%s673_s3 + $0x70] sm:$0xff]  }
   0xc   :  { %194 = vmatpush1.bf16.msra.mxu1 %v489_v9  ;;  %v518_v42 = vld [vmem:[%s673_s3 + $0x30] sm:$0xff]   ;;  %v519_v43 = vld [vmem:[%s673_s3 + $0x78] sm:$0xff]   ;;  %v22_v48 = vld [vmem:[%s674_s4 + $0x1] sm:$0x3] }
   0xd   :  { %195 = vmatprep.subr.bf16.mxu1 %v490_v10  ;;  %453 = vmatpush3.bf16.msra.mxu0 %v508_v24  ;;  %v520_v44 = vld [vmem:[%s673_s3 + $0x38] sm:$0xff]   ;;  %v102_v50 = vrot.slane %v22_v48, %v101_v47  ;;  %v106_v51 = vrot.slane %v22_v48, %v105_v49  ;;  %v431_v63 = vld [vmem:[%s674_s4 + $0x3] ss:$0 sm:$0xff] }
   0xe   :  { %454 = vmatprep.subr.bf16.mxu0 %v509_v25 }
  0x10   :  { %196 = vmatpush1.bf16.msra.mxu1 %v492_v11 }
  0x11   :  { %197 = vmatprep.subr.bf16.mxu1 %v493_v12  ;;  %455 = vmatpush3.bf16.msra.mxu0 %v510_v26 }
  0x12   :  { %456 = vmatprep.subr.bf16.mxu0 %v511_v27 }
  0x14   :  { %198 = vmatpush1.bf16.msra.mxu1 %v495_v13 }
  0x15   :  { %199 = vmatprep.subr.bf16.mxu1 %v496_v14  ;;  %457 = vmatpush3.bf16.msra.mxu0 %v512_v28 }
  0x16   :  { %458 = vmatprep.subr.bf16.mxu0 %v513_v29 }
  0x18   :  { %200 = vmatpush1.bf16.msra.mxu1 %v498_v15 }
  0x19   :  { %201 = vmatprep.subr.bf16.mxu1 %v499_v16  ;;  %459 = vmatpush3.bf16.msra.mxu0 %v514_v30 }
  0x1a   :  { %460 = vmatprep.subr.bf16.mxu0 %v515_v31 }
  0x1c   :  { %202 = vmatpush1.bf16.msra.mxu1 %v501_v17 }
  0x1d   :  { %203 = vmatprep.subr.bf16.mxu1 %v502_v18  ;;  %461 = vmatpush3.bf16.msra.mxu0 %v516_v32 }
  0x1e   :  { %462 = vmatprep.subr.bf16.mxu0 %v517_v41 }
  0x20   :  { %204 = vmatpush1.bf16.msra.mxu1 %v504_v19 }
  0x21   :  { %463 = vmatpush3.bf16.msra.mxu0 %v518_v42 }
  0x22   :  { %464 = vmatprep.subr.bf16.mxu0 %v519_v43 }
  0x25   :  { %465 = vmatpush3.bf16.msra.mxu0 %v520_v44 }
  0xd9   :  { %v74_v34 = vpop.f32.mrb[0].mxu0 }
  0xda   :  { %v75_v35 = vadd.f32 %v413_v33, %v74_v34  ;;  %v476_v36 = vpop.f32.mrb[1].mxu0 }
  0xdb   :  { %v77_v37 = vpop.f32.mrb[2].mxu0 }
  0xdc   :  { %v80_v38 = vmax.f32 %v75_v35, 0.0  ;;  %v477_v39 = vpop.f32.mrb[3].mxu0 }
  0xde   :  { %v81_v40 = vpack.c.bf16 %v80_v38, %v80_v38 }
  0xe0   :  { %222 = vmatmul.mubr.bf16.vlgmr.msra.gmra.mrb[0].mxu1 %v81_v40 }
 0x1b3   :  { %v223_v52 = vpop.f32.mrb[0].mxu1 }
 0x1b4   :  { %v224_v53 = vadd.f32 %v223_v52, %v102_v50  ;;  %v225_v54 = vpop.f32.mrb[1].mxu1 }
 0x1b5   :  { %v226_v55 = vadd.f32 %v225_v54, %v106_v51  ;;  %v227_v56 = vpop.f32.mrb[2].mxu1 }
 0x1b6   :  { %v230_v57 = vmax.f32 %v224_v53, 0.0  ;;  %v228_v58 = vpop.f32.mrb[3].mxu1 }
 0x1b7   :  { %v231_v59 = vmax.f32 %v226_v55, 0.0 }
 0x1b8   :  { %v232_v61 = vpack.c.bf16 %v230_v57, %v230_v57 }
 0x1b9   :  { %v233_v60 = vpack.c.bf16 %v231_v59, %v231_v59 }
 0x1bb   :  { %400 = vmatprep.mubr.bf16.mxu0 %v233_v60 }
 0x1bc   :  { %401 = vmatmul.mubr.bf16.vlgmr.msra.gmra.mrb[4].mxu0 %v232_v61 }
 0x28f   :  { %v466_v62 = vpop.f32.mrb[4].mxu0 }
 0x290   :  { %v467_v0 = vpop.f32.mrb[5].mxu0 }
 0x291   :  { %v468_v1 = vadd.f32 %v467_v0, %v466_v62  ;;  %v469_v2 = vpop.f32.mrb[6].mxu0 }
 0x292   :  { %v470_v3 = vpop.f32.mrb[7].mxu0 }
 0x293   :  { %v403_v4 = vadd.f32 %v468_v1, %v431_v63 }
 0x295   :  { %408 = vst.msk [vmem:[%s675_s5] sm:$0xff] %vm32_vm2, %v403_v4 }

</bundles_post_ra>
